<compile_context>
chip_gen: v5e
topology: v5e:2x2
jax: 0.10.0
libtpu: 0.0.40
codegen_flags: <defaults>
</compile_context>

<pallas_src>
import functools
import math

import jax
import jax.numpy as jnp
import numpy as np
from jax.experimental import pallas as pl
from jax.experimental.pallas import tpu as pltpu


def _cdiv(a, b):
    return -(-a // b)


def _round_up(a, m):
    return _cdiv(a, m) * m


def _num_pieces(dtype):
    """Number of bf16-exact pieces needed so hi+...+lo == x exactly."""
    if dtype == jnp.bfloat16:
        return 1
    if dtype == jnp.float16:
        return 2
    return 3  # float32


def _expand_kernel(scat_ref, x_ref, o_ref, *, gain, pieces):
    """One (batch, channel-block) step of Expand (depth-to-space).

    scat_ref: VMEM (pieces*s*W, s*W) bf16  0/1 lane-interleave matrix (resident)
    x_ref:    VMEM (1, s*s, CH, W)         input  viewed as (N, s*s, C_out*H, W)
    o_ref:    VMEM (1, CH, s*s*W)          output viewed as (N, C_out*H, s*s*W)

    out[row, a*(s*W) + w*s + b] = x[a*s + b, row, w],  row = c*H + h
    """
    s = gain
    _, _, CH, W = x_ref.shape
    sw = s * W

    scat = scat_ref[...]                      # tiny, loaded once per step

    for a in range(s):                        # s is tiny -> static unroll
        # Build the K-concatenated bf16 operand: k = piece*(s*W) + b*W + w.
        groups = [[] for _ in range(pieces)]
        for b in range(s):
            chunk = x_ref[0, a * s + b]       # (CH, W)
            if pieces == 1:
                groups[0].append(chunk.astype(jnp.bfloat16))
            else:
                rem = chunk.astype(jnp.float32)
                for p in range(pieces):
                    piece = rem.astype(jnp.bfloat16)
                    groups[p].append(piece)
                    if p + 1 < pieces:
                        rem = rem - piece.astype(jnp.float32)
        lhs = jnp.concatenate([g for grp in groups for g in grp], axis=-1)

        # Single MXU matmul per `a`: accumulation over pieces and b happens
        # inside the MXU (exact -- each scatter column holds exactly one 1).
        res = jnp.dot(lhs, scat, preferred_element_type=jnp.float32)  # (CH, s*W)

        # Contiguous per-`a` store; lane-dense/unmasked whenever s*W % 128 == 0.
        o_ref[0, :, a * sw:(a + 1) * sw] = res.astype(o_ref.dtype)


def _scatter_matrix(gain, W, pieces):
    """(pieces*s*W, s*W) bf16 matrix with S[p*(s*W)+b*W+w, w*s+b] = 1."""
    s = gain
    P = np.zeros((s * W, s * W), np.float32)
    w = np.arange(W)
    for b in range(s):
        P[b * W + w, w * s + b] = 1.0
    return jnp.asarray(np.tile(P, (pieces, 1)), dtype=jnp.bfloat16)


def _choose_c_block(c_out, H, N, per_c_bytes, fixed_bytes, vmem_target_bytes):
    """Channels per grid step, sized against an honest VMEM budget."""
    cap = max(1, int((vmem_target_bytes - fixed_bytes) // max(per_c_bytes, 1)))
    c_block = max(1, min(cap, c_out))

    # Megacore (v7x): aim for >= ~8 total grid steps so both TensorCores get
    # several balanced blocks (no-op for small problems).
    min_steps = 8
    steps = _cdiv(c_out, c_block)
    if N * steps < min_steps:
        steps = min(c_out, max(steps, _cdiv(min_steps, max(N, 1))))
        c_block = _cdiv(c_out, steps)

    # Prefer an exact divisor of c_out (no ragged tail block) if one is close.
    for d in range(c_block, 0, -1):
        if c_out % d == 0:
            if 2 * d >= c_block:
                c_block = d
            break

    # Keep the merged (c_block*H) sublane dim 8-aligned when blocking channels
    # (full-extent blocks are exempt from the (8,128) rule).
    if c_block < c_out:
        g = 8 // math.gcd(H, 8)
        if c_block % g:
            c_block = min(c_out, _round_up(c_block, g))
    return c_block


def expand_forward(x, gain=2, *, c_block=None,
                   vmem_target_bytes=24 * 1024 * 1024):
    """Expand.forward(x): (N, C, H, W) -> (N, C // gain**2, H*gain, W*gain)."""
    N, C, H, W = x.shape
    s = gain
    assert C % (s * s) == 0, "channels must be divisible by gain**2"
    c_out = C // (s * s)

    if x.dtype not in (jnp.float32, jnp.bfloat16, jnp.float16):
        # TODO(synk): exotic dtypes fall back to plain XLA (Expand is a pure view op).
        return _reference(x, gain)

    pieces = _num_pieces(x.dtype)
    isz = x.dtype.itemsize

    # Free (bitcast) views: channels split into (s*s, C_out) and H merged into
    # the row axis so the kernel needs no in-kernel reshapes at all.
    x_v = x.reshape(N, s * s, c_out * H, W)

    # Honest per-channel VMEM accounting (lane padding + temporaries).
    Wp = _round_up(W, 128)               # lane-padded input width
    Wn = _round_up(s * W, 128)           # lane-padded matmul-result width
    Wo = _round_up(s * s * W, 128)       # lane-padded output width
    per_c = (2 * s * s * H * Wp * isz    # input block, double-buffered
             + 2 * H * Wo * isz          # output block, double-buffered
             + H * pieces * s * Wp * 2   # bf16 K-concat operand (one `a` live)
             + H * Wn * 4                # f32 matmul result (one `a` live)
             + 4 * H * Wp * 4)           # chunk/rem/piece f32 transients
    fixed = 2 * _round_up(pieces * s * W, 8) * Wn * 2   # resident scatter matrix

    if c_block is None:
        c_block = _choose_c_block(c_out, H, N, per_c, fixed, vmem_target_bytes)
    grid = (N, _cdiv(c_out, c_block))

    scat = _scatter_matrix(s, W, pieces)

    vmem_limit = int(min(56 * 1024 * 1024,
                         max(32 * 1024 * 1024,
                             c_block * per_c + fixed + (4 << 20))))

    out_view = pl.pallas_call(
        functools.partial(_expand_kernel, gain=s, pieces=pieces),
        out_shape=jax.ShapeDtypeStruct((N, c_out * H, s * s * W), x.dtype),
        grid=grid,
        in_specs=[
            # 0/1 interleave matrix: constant block index -> stays resident.
            pl.BlockSpec((pieces * s * W, s * W), lambda n, ci: (0, 0)),
            pl.BlockSpec((1, s * s, c_block * H, W),
                         lambda n, ci: (n, 0, ci, 0)),
        ],
        out_specs=pl.BlockSpec((1, c_block * H, s * s * W),
                               lambda n, ci: (n, ci, 0)),
        compiler_params=pltpu.CompilerParams(
            dimension_semantics=("parallel", "parallel"),
            vmem_limit_bytes=vmem_limit),
        cost_estimate=pl.CostEstimate(
            flops=2 * pieces * (s * W) * (N * c_out * H * s * s * W),
            transcendentals=0,
            bytes_accessed=2 * x.size * isz + pieces * s * W * s * W * 2),
    )(scat, x_v)

    # Free reshape back to the PyTorch output shape (N, C_out, H*s, W*s).
    return out_view.reshape(N, c_out, H * s, W * s)


def _reference(x, gain=2):
    """Pure-JAX transcription of Expand.forward."""
    N, C, H, W = x.shape
    s = gain
    y = x.reshape(N, s, s, C // (s * s), H, W)
    y = jnp.transpose(y, (0, 3, 4, 1, 5, 2))
    return y.reshape(N, C // (s * s), H * s, W * s)


if __name__ == "__main__":
    key = jax.random.PRNGKey(0)
    N, C, H, W = 2, 4, 16, 16
    gain = 2

    expand = jax.jit(functools.partial(expand_forward, gain=gain))

    # float32 input -> 3-piece bf16-exact path.
    x32 = jax.random.normal(key, (N, C, H, W), dtype=jnp.float32)
    out32 = jax.block_until_ready(expand(x32))
    ref32 = jax.block_until_ready(_reference(x32, gain=gain))
    assert out32.shape == (N, C // gain ** 2, H * gain, W * gain)
    assert jnp.allclose(out32, ref32, atol=1e-5, rtol=1e-5), "f32 mismatch"

    # bfloat16 input -> single-matmul path (no split).
    xbf = x32.astype(jnp.bfloat16)
    outbf = jax.block_until_ready(expand(xbf))
    refbf = jax.block_until_ready(_reference(xbf, gain=gain))
    assert jnp.allclose(outbf.astype(jnp.float32), refbf.astype(jnp.float32),
                        atol=1e-5, rtol=1e-5), "bf16 mismatch"

    print("KERNEL_OK")
</pallas_src>

<mosaic_0001>
module attributes {stable_mosaic.version = 11 : i64} {
  func.func @_expand_kernel(%arg0: i32, %arg1: i32, %arg2: memref<96x32xbf16, #tpu.memory_space<vmem>>, %arg3: memref<1x4x16x16xf32, #tpu.memory_space<vmem>>, %arg4: memref<1x16x64xf32, #tpu.memory_space<vmem>>) attributes {dimension_semantics = [#tpu.dimension_semantics<parallel>, #tpu.dimension_semantics<parallel>], iteration_bounds = array<i64: 2, 1>, scalar_prefetch = 0 : i64, scratch_operands = 0 : i64, tpu.core_type = #tpu.core_type<tc>, window_params = [{pipeline_mode = #tpu.pipeline_mode<synchronous>, transform_indices = @transform_0, window_bounds = array<i64: 96, 32>}, {transform_indices = @transform_1, window_bounds = array<i64: 1, 4, 16, 16>}, {transform_indices = @transform_2, window_bounds = array<i64: 1, 16, 64>}]} {
    %c0 = arith.constant 0 : index
    %c0_0 = arith.constant 0 : index
    %0 = vector.load %arg2[%c0, %c0_0] : memref<96x32xbf16, #tpu.memory_space<vmem>>, vector<96x32xbf16>
    %c0_1 = arith.constant 0 : index
    %c0_2 = arith.constant 0 : index
    %c0_3 = arith.constant 0 : index
    %c0_4 = arith.constant 0 : index
    %1 = vector.load %arg3[%c0_1, %c0_2, %c0_3, %c0_4] : memref<1x4x16x16xf32, #tpu.memory_space<vmem>>, vector<1x1x16x16xf32>
    %2 = vector.shape_cast %1 : vector<1x1x16x16xf32> to vector<16x16xf32>
    %3 = arith.truncf %2 : vector<16x16xf32> to vector<16x16xbf16>
    %4 = arith.extf %3 : vector<16x16xbf16> to vector<16x16xf32>
    %5 = arith.subf %2, %4 : vector<16x16xf32>
    %6 = arith.truncf %5 : vector<16x16xf32> to vector<16x16xbf16>
    %7 = arith.extf %6 : vector<16x16xbf16> to vector<16x16xf32>
    %8 = arith.subf %5, %7 : vector<16x16xf32>
    %9 = arith.truncf %8 : vector<16x16xf32> to vector<16x16xbf16>
    %c0_5 = arith.constant 0 : index
    %c1 = arith.constant 1 : index
    %c0_6 = arith.constant 0 : index
    %c0_7 = arith.constant 0 : index
    %10 = vector.load %arg3[%c0_5, %c1, %c0_6, %c0_7] : memref<1x4x16x16xf32, #tpu.memory_space<vmem>>, vector<1x1x16x16xf32>
    %11 = vector.shape_cast %10 : vector<1x1x16x16xf32> to vector<16x16xf32>
    %12 = arith.truncf %11 : vector<16x16xf32> to vector<16x16xbf16>
    %13 = arith.extf %12 : vector<16x16xbf16> to vector<16x16xf32>
    %14 = arith.subf %11, %13 : vector<16x16xf32>
    %15 = arith.truncf %14 : vector<16x16xf32> to vector<16x16xbf16>
    %16 = arith.extf %15 : vector<16x16xbf16> to vector<16x16xf32>
    %17 = arith.subf %14, %16 : vector<16x16xf32>
    %18 = arith.truncf %17 : vector<16x16xf32> to vector<16x16xbf16>
    %19 = tpu.concatenate %3, %12, %6, %15, %9, %18 in 1 : vector<16x16xbf16>, vector<16x16xbf16>, vector<16x16xbf16>, vector<16x16xbf16>, vector<16x16xbf16>, vector<16x16xbf16> -> vector<16x96xbf16>
    %cst = arith.constant dense<0.000000e+00> : vector<16x32xf32>
    %20 = tpu.matmul %19, %0, %cst {dimension_numbers = #tpu.dot_dimension_numbers<[1], [0], [0], [1], [0, 0, 1, 1], [], []>} : vector<16x96xbf16>, vector<96x32xbf16>, vector<16x32xf32> -> vector<16x32xf32>
    %c0_8 = arith.constant 0 : index
    %c0_9 = arith.constant 0 : index
    %c0_10 = arith.constant 0 : index
    %21 = vector.load %arg4[%c0_8, %c0_9, %c0_10] : memref<1x16x64xf32, #tpu.memory_space<vmem>>, vector<1x16x32xf32>
    %22 = vector.shape_cast %21 : vector<1x16x32xf32> to vector<16x32xf32>
    %23 = vector.shape_cast %20 : vector<16x32xf32> to vector<1x16x32xf32>
    tpu.vector_store %arg4[%c0_8, %c0_9, %c0_10], %23 {strides = array<i32>} : memref<1x16x64xf32, #tpu.memory_space<vmem>>, vector<1x16x32xf32>,
    %c0_11 = arith.constant 0 : index
    %c2 = arith.constant 2 : index
    %c0_12 = arith.constant 0 : index
    %c0_13 = arith.constant 0 : index
    %24 = vector.load %arg3[%c0_11, %c2, %c0_12, %c0_13] : memref<1x4x16x16xf32, #tpu.memory_space<vmem>>, vector<1x1x16x16xf32>
    %25 = vector.shape_cast %24 : vector<1x1x16x16xf32> to vector<16x16xf32>
    %26 = arith.truncf %25 : vector<16x16xf32> to vector<16x16xbf16>
    %27 = arith.extf %26 : vector<16x16xbf16> to vector<16x16xf32>
    %28 = arith.subf %25, %27 : vector<16x16xf32>
    %29 = arith.truncf %28 : vector<16x16xf32> to vector<16x16xbf16>
    %30 = arith.extf %29 : vector<16x16xbf16> to vector<16x16xf32>
    %31 = arith.subf %28, %30 : vector<16x16xf32>
    %32 = arith.truncf %31 : vector<16x16xf32> to vector<16x16xbf16>
    %c0_14 = arith.constant 0 : index
    %c3 = arith.constant 3 : index
    %c0_15 = arith.constant 0 : index
    %c0_16 = arith.constant 0 : index
    %33 = vector.load %arg3[%c0_14, %c3, %c0_15, %c0_16] : memref<1x4x16x16xf32, #tpu.memory_space<vmem>>, vector<1x1x16x16xf32>
    %34 = vector.shape_cast %33 : vector<1x1x16x16xf32> to vector<16x16xf32>
    %35 = arith.truncf %34 : vector<16x16xf32> to vector<16x16xbf16>
    %36 = arith.extf %35 : vector<16x16xbf16> to vector<16x16xf32>
    %37 = arith.subf %34, %36 : vector<16x16xf32>
    %38 = arith.truncf %37 : vector<16x16xf32> to vector<16x16xbf16>
    %39 = arith.extf %38 : vector<16x16xbf16> to vector<16x16xf32>
    %40 = arith.subf %37, %39 : vector<16x16xf32>
    %41 = arith.truncf %40 : vector<16x16xf32> to vector<16x16xbf16>
    %42 = tpu.concatenate %26, %35, %29, %38, %32, %41 in 1 : vector<16x16xbf16>, vector<16x16xbf16>, vector<16x16xbf16>, vector<16x16xbf16>, vector<16x16xbf16>, vector<16x16xbf16> -> vector<16x96xbf16>
    %cst_17 = arith.constant dense<0.000000e+00> : vector<16x32xf32>
    %43 = tpu.matmul %42, %0, %cst_17 {dimension_numbers = #tpu.dot_dimension_numbers<[1], [0], [0], [1], [0, 0, 1, 1], [], []>} : vector<16x96xbf16>, vector<96x32xbf16>, vector<16x32xf32> -> vector<16x32xf32>
    %c0_18 = arith.constant 0 : index
    %c0_19 = arith.constant 0 : index
    %c32 = arith.constant 32 : index
    %44 = vector.load %arg4[%c0_18, %c0_19, %c32] : memref<1x16x64xf32, #tpu.memory_space<vmem>>, vector<1x16x32xf32>
    %45 = vector.shape_cast %44 : vector<1x16x32xf32> to vector<16x32xf32>
    %46 = vector.shape_cast %43 : vector<16x32xf32> to vector<1x16x32xf32>
    tpu.vector_store %arg4[%c0_18, %c0_19, %c32], %46 {strides = array<i32>} : memref<1x16x64xf32, #tpu.memory_space<vmem>>, vector<1x16x32xf32>,
    return
  }
  func.func @transform_0(%arg0: i32, %arg1: i32) -> (i32, i32) {
    %c0_i32 = arith.constant 0 : i32
    %c0_i32_0 = arith.constant 0 : i32
    %c0_i32_1 = arith.constant 0 : i32
    return %c0_i32, %c0_i32_0 : i32, i32
  }
  func.func @transform_1(%arg0: i32, %arg1: i32) -> (i32, i32, i32, i32) {
    %c0_i32 = arith.constant 0 : i32
    %c0_i32_0 = arith.constant 0 : i32
    %c0_i32_1 = arith.constant 0 : i32
    return %arg0, %c0_i32, %arg1, %c0_i32_0 : i32, i32, i32, i32
  }
  func.func @transform_2(%arg0: i32, %arg1: i32) -> (i32, i32, i32) {
    %c0_i32 = arith.constant 0 : i32
    %c0_i32_0 = arith.constant 0 : i32
    return %arg0, %arg1, %c0_i32 : i32, i32, i32
  }
}

</mosaic_0001>

<bundles_post_ra>
// kernel: expand_forward.1
= control target key start
LH: loop header
LB: loop body
LE: loop exit
PB: predicated region body
PF: predicated region fallthrough
CT: control target
= control target key end

     0   :  { %7 = vsyncpa [#allocation3], 0  ;;  %s1037_s0 = inlined_call_operand.hbm [shape: bf16[96,32], index: 0, kind: input, shape index: {}]   ;;  %s1038_s1 = inlined_call_operand.hbm [shape: f32[2,4,16,16], index: 1, kind: input, shape index: {}]   ;;  %s1039_s2 = inlined_call_operand.vmem [shape: f32[2,16,64], index: 2, kind: output, shape index: {}]  }
   0x1   :  { %8 = vsyncpa [#allocation5], 0 }
   0x2   :  { %10 = vsyncpa [#allocation5 + $0x1], 0  ;;  %s858_s9 = smov 0   ;;  %s860_s10 = smov 0  }
   0x3   :  { %s862_s11 = smov 0   ;;  %s864_s12 = smov 0  }
   0x4   :  { %s866_s13 = smov 0   ;;  %s868_s14 = smov 0  }
   0x5 LB: > { %s587_s15 = sadd.s32 4294967295, %s831_s14   ;;  %p71_p0 = scmp.ne.s32.totalorder %s815_s10, %s811_s9  ;;  %s831_s14 = sphi %s868_s14, %s16_s14   ;;  %s827_s13 = sphi %s866_s13, %s1048_s13   ;;  %s823_s12 = sphi %s864_s12, %s1047_s12   ;;  %s819_s11 = sphi %s862_s11, %s1046_s11   ;;  %s815_s10 = sphi %s860_s10, %s1045_s10   ;;  %s811_s9 = sphi %s858_s9, %s1044_s9  }
   0x6   : > { %p888_p1 = scmp.eq.s32.totalorder %s587_s15, 0  ;;  %p589_p2 = scmp.ge.s32.totalorder %s831_s14, 1 }
   0x7   : > { %p110_p3 = scmp.lt.s32.totalorder %s831_s14, 3  ;;  %s121_s20 = sshll.u32 %s1037_s0, 4  ;;  %s122_s20 = int_to_ptr.hbm [resolvable:$true] %s121_s20 }
   0x8   : > { %p896_p4 = por %p888_p1, %p71_p0  ;;  %s833_s22 = smov [#allocation2]  }
   0x9   : > { %p903_p5 = pnand %p589_p2, %p110_p3  ;;  %s123_s23 = sshll.u32 %s833_s22, 4  ;;  %s124_s23 = int_to_ptr.vmem [resolvable:$true] %s123_s23 }
   0xa   : > { %s834_s24 = smov 64   ;;  %s835_s25 = smov 4  }
   0xb   : > { %p648_p6 = pneg %p903_p5  ;;  %s28_s26 = sadd.s32 1, %s827_s13 }
   0xc   : > { %p30_p8 = scmp.ge.s32.totalorder %s28_s26, 2  ;;  %s58_s27 = sadd.s32 1, %s819_s11 }
   0xd   : > { %p649_p7 = pnand %p648_p6, %p888_p1  ;;  %p65_p9 = scmp.ne.s32.totalorder %s819_s11, %s815_s10 }
   0xe   : > { %p66_p10 = scmp.eq.s32.totalorder %s831_s14, 0  ;;  %s1050_s26 = smov (%p30_p8, %s28_s26), 0 }
   0xf   : > { %651 = dma.hbm_to_vmem [thread:$0]  (!%p649_p7), %s122_s20, 768, %s124_s23, [#allocation3], %s834_s24, %s834_s24, %s835_s25  }
  0x10   : > { %p918_p11 = por %p66_p10, %p65_p9  ;;  %p657_p12 = scmp.lt.s32.totalorder %s831_s14, 2 }
  0x11   : > { %s53_s29 = ssub.s32 %s827_s13, %s1050_s26  ;;  %s137_s30 = sand.u32 1, %s819_s11  }
  0x12   : > { %p56_p13 = scmp.eq.s32.totalorder %s53_s29, 0  ;;  %s592_s3 = sshll.u32 %s137_s30, 6 }
  0x13   : > { %s634_s4 = sshll.u32 %s827_s13, 6  ;;  %s141_s15 = scalar_lea.vmem [#allocation4], %s592_s3 }
  0x14   : > { %s928_s5 = scalar_select %p56_p13, %s819_s11, %s58_s27  }
  0x15   : > { %s148_s8 = scalar_lea.hbm %s1038_s1, %s634_s4  ;;  %s151_s18 = sshll.u32 %s141_s15, 4  ;;  %s152_s18 = int_to_ptr.vmem [resolvable:$true] %s151_s18 }
  0x16   : > { %s149_s9 = sshll.u32 %s148_s8, 4  ;;  %p653_p0 = pnand %p657_p12, %p918_p11  ;;  %s150_s9 = int_to_ptr.hbm [resolvable:$true] %s149_s9 }
  0x17   : > { %s138_s19 = scalar_lea.sflag [#allocation5], %s137_s30  ;;  %s836_s20 = smov 128  }
  0x18   : > { %s837_s22 = smov 8   ;;  %163 = sbr.rel (%p903_p5) target bundleno = 415 (0x19f), region = 28 }
  0x19   : > { %655 = dma.hbm_to_vmem [thread:$0]  (!%p653_p0), %s150_s9, 1024, %s152_s18, %s138_s19, %s836_s20, %s836_s20, %s837_s22  }
  0x1d   : > { %802 = dma.done.wait (%p888_p1), [#allocation3], 768  }
  0x1e   : > { %804 = vsyncadd (%p888_p1), [#allocation3], 4294966528  ;;  %s170_s23 = sand.u32 1, %s815_s10  }
  0x1f   : > { %s597_s24 = sshll.u32 %s170_s23, 6  ;;  %s171_s25 = scalar_lea.sflag [#allocation5], %s170_s23 }
  0x20   : > { %s174_s27 = scalar_lea.vmem [#allocation4], %s597_s24 }
  0x21   : > { %806 = dma.done.wait (%p896_p4), %s171_s25, 1024  }
  0x22   : > { %808 = vsyncadd (%p896_p4), %s171_s25, 4294966272  ;;  %v629_v0 = vld [vmem:[%s174_s27 + $0x30] sm:$0xff]  ;;  %v630_v1 = vld [vmem:[%s174_s27 + $0x38] sm:$0xff]  ;;  %s838_s16 = smov 16   ;;  %s839_s17 = smov 48   ;;  %vm297_vm0 = vcmask 130048  }
  0x23   : > { %v627_v2 = vld [vmem:[%s174_s27 + $0x20] sm:$0xff]  ;;  %v388_v3 = vpack.c.bf16 %v629_v0, %v629_v0  ;;  %v389_v4 = vpack.c.bf16 %v630_v1, %v630_v1  ;;  %v628_v5 = vld [vmem:[%s174_s27 + $0x28] sm:$0xff]  ;;  %v600_v12 = vld [vmem:[%s174_s27 + $0x10] sm:$0xff]  ;;  %s840_s21 = smov 32   ;;  %s841_s28 = smov 80   ;;  %vm301_vm1 = vcmask 261120  }
  0x24   : > { %v948_v6 = vpack.c.bf16 %v627_v2, %v627_v2  ;;  %v224_v7 = vld [vmem:[%s174_s27] sm:$0xff]  ;;  %v225_v8 = vld [vmem:[%s174_s27 + $0x8] sm:$0xff]  ;;  %v950_v9 = vpack.c.bf16 %v628_v5, %v628_v5  ;;  %v641_v13 = vld [vmem:[#allocation2 + $0x28] sm:$0xff]  ;;  %v960_v27 = vpack.c.bf16 %v600_v12, %v600_v12  ;;  %s842_s29 = smov 64   ;;  %vm304_vm2 = vcmask 392192   ;;  %p202_p1 = scmp.lt.s32.totalorder %s823_s12, 1 }
  0x25   : > { %v952_v10 = vpack.c.bf16 %v224_v7, %v224_v7  ;;  %v954_v11 = vpack.c.bf16 %v225_v8, %v225_v8  ;;  %v391_v14 = vunpack.c.l.bf16 %v389_v4  ;;  %v409_v15 = vunpack.c.l.b16 %v388_v3  ;;  %v601_v22 = vld [vmem:[%s174_s27 + $0x18] sm:$0xff]  ;;  %457 = vmatpush.bf16.msra.mxu1 %v641_v13  ;;  %v640_v23 = vld [vmem:[#allocation2 + $0x20] sm:$0xff]  ;;  %354 = vmatpush.bf16.msra.mxu0 %v641_v13 }
  0x26   : > { %v410_v16 = vunpack.c.l.b16 %v389_v4  ;;  %v390_v17 = vunpack.c.l.bf16 %v388_v3  ;;  %v373_v18 = vunpack.c.l.bf16 %v948_v6  ;;  %v374_v19 = vunpack.c.l.bf16 %v950_v9  ;;  %s1052_s12 = smov (!%p202_p1, %s823_s12), 1 }
  0x27   : > { %v228_v20 = vunpack.c.l.bf16 %v952_v10  ;;  %v229_v21 = vunpack.c.l.bf16 %v954_v11  ;;  %v393_v26 = vsub.f32 %v630_v1, %v391_v14  ;;  %v967_v34 = vpack.c.bf16 %v601_v22, %v601_v22  ;;  %s635_s30 = sshll.u32 %s1052_s12, 4 }
  0x28   : > { %v411_v24 = vpack.c.b16 %v410_v16, %v409_v15  ;;  %v392_v25 = vsub.f32 %v629_v0, %v390_v17  ;;  %v375_v28 = vsub.f32 %v627_v2, %v373_v18  ;;  %v376_v29 = vsub.f32 %v628_v5, %v374_v19  ;;  %s209_s6 = scalar_lea.vmem %s1039_s2, %s635_s30 }
  0x29   : > { %v962_v30 = vsub.f32 %v224_v7, %v228_v20  ;;  %v964_v31 = vsub.f32 %v225_v8, %v229_v21  ;;  %v395_v33 = vpack.c.bf16 %v393_v26, %v393_v26  ;;  %v245_v35 = vunpack.c.l.bf16 %v960_v27  ;;  %458 = vmatpush.bf16.msra.mxu1 %v640_v23  ;;  %355 = vmatpush.bf16.msra.mxu0 %v640_v23 }
  0x2a   : > { %412 = vrot.lane.b32.xlu0 %v411_v24, %s838_s16  ;;  %v394_v32 = vpack.c.bf16 %v392_v25, %v392_v25  ;;  %v377_v36 = vpack.c.bf16 %v375_v28, %v375_v28  ;;  %v378_v37 = vpack.c.bf16 %v376_v29, %v376_v29  ;;  %v246_v56 = vunpack.c.l.bf16 %v967_v34  ;;  %v639_v24 = vld [vmem:[#allocation2 + $0x18] sm:$0xff] }
  0x2b   : > { %v972_v38 = vpack.c.bf16 %v962_v30, %v962_v30  ;;  %v976_v39 = vpack.c.bf16 %v964_v31, %v964_v31  ;;  %v424_v41 = vunpack.c.l.b16 %v395_v33  ;;  %v397_v43 = vunpack.c.l.bf16 %v395_v33 }
  0x2c   : > { %v423_v40 = vunpack.c.l.b16 %v394_v32  ;;  %v396_v42 = vunpack.c.l.bf16 %v394_v32  ;;  %v416_v44 = vunpack.c.l.b16 %v377_v36  ;;  %v417_v45 = vunpack.c.l.b16 %v378_v37 }
  0x2d   : > { %v379_v46 = vunpack.c.l.bf16 %v377_v36  ;;  %v380_v47 = vunpack.c.l.bf16 %v378_v37  ;;  %v399_v50 = vsub.f32 %v393_v26, %v397_v43  ;;  %v247_v57 = vsub.f32 %v600_v12, %v245_v35  ;;  %459 = vmatpush.bf16.msra.mxu1 %v639_v24  ;;  %356 = vmatpush.bf16.msra.mxu0 %v639_v24  ;;  %v637_v37 = vld [vmem:[#allocation2 + $0x8] sm:$0xff]  ;;  %v636_v43 = vld [vmem:[#allocation2] sm:$0xff] }
  0x2e   : > { %v425_v48 = vpack.c.b16 %v424_v41, %v423_v40  ;;  %v398_v49 = vsub.f32 %v392_v25, %v396_v42  ;;  %v418_v51 = vpack.c.b16 %v417_v45, %v416_v44  ;;  %v271_v60 = vunpack.c.l.b16 %v972_v38 }
  0x2f   : > { %v381_v52 = vsub.f32 %v375_v28, %v379_v46  ;;  %v382_v53 = vsub.f32 %v376_v29, %v380_v47  ;;  %v401_v55 = vpack.c.bf16 %v399_v50, %v399_v50  ;;  %v272_v61 = vunpack.c.l.b16 %v976_v39  ;;  %v638_v29 = vld [vmem:[#allocation2 + $0x10] sm:$0xff] }
  0x30   : > { %426 = vrot.lane.b32.xlu1 %v425_v48, %s839_s17  ;;  %v400_v54 = vpack.c.bf16 %v398_v49, %v398_v49  ;;  %v248_v0 = vsub.f32 %v601_v22, %v246_v56  ;;  %v249_v1 = vpack.c.bf16 %v247_v57, %v247_v57  ;;  %v264_v25 = vunpack.c.l.b16 %v960_v27 }
  0x31   : > { %v383_v58 = vpack.c.bf16 %v381_v52, %v381_v52  ;;  %v384_v59 = vpack.c.bf16 %v382_v53, %v382_v53  ;;  %v438_v63 = vunpack.c.l.b16 %v401_v55  ;;  %v273_v12 = vpack.c.b16 %v272_v61, %v271_v60  ;;  %460 = vmatpush.bf16.msra.mxu1 %v638_v29  ;;  %357 = vmatpush.bf16.msra.mxu0 %v638_v29 }
  0x32   : > { %419 = vrot.lane.b32.xlu0 %v418_v51, %s840_s21  ;;  %v437_v62 = vunpack.c.l.b16 %v400_v54  ;;  %v250_v5 = vpack.c.bf16 %v248_v0, %v248_v0  ;;  %v251_v7 = vunpack.c.l.bf16 %v249_v1  ;;  %v278_v15 = vunpack.c.l.b16 %v249_v1 }
  0x33   : > { %v430_v2 = vunpack.c.l.b16 %v383_v58  ;;  %v431_v3 = vunpack.c.l.b16 %v384_v59  ;;  %v265_v26 = vunpack.c.l.b16 %v967_v34  ;;  %v234_v32 = vunpack.c.l.bf16 %v972_v38 }
  0x34   : > { %v439_v4 = vpack.c.b16 %v438_v63, %v437_v62  ;;  %v252_v13 = vunpack.c.l.bf16 %v250_v5  ;;  %v253_v14 = vsub.f32 %v247_v57, %v251_v7  ;;  %v279_v16 = vunpack.c.l.b16 %v250_v5 }
  0x35   : > { %v432_v8 = vpack.c.b16 %v431_v3, %v430_v2  ;;  %v266_v28 = vpack.c.b16 %v265_v26, %v264_v25  ;;  %v235_v33 = vunpack.c.l.bf16 %v976_v39  ;;  %v236_v35 = vsub.f32 %v962_v30, %v234_v32  ;;  %461 = vmatpush.bf16.msra.mxu1 %v637_v37  ;;  %358 = vmatpush.bf16.msra.mxu0 %v637_v37 }
  0x36   : > { %440 = vrot.lane.b32.xlu2 %v439_v4, %s841_s28  ;;  %v254_v17 = vsub.f32 %v248_v0, %v252_v13  ;;  %v255_v18 = vpack.c.bf16 %v253_v14, %v253_v14  ;;  %v280_v21 = vpack.c.b16 %v279_v16, %v278_v15  ;;  %v404_v39 = vunpack.c.l.b16 %v948_v6 }
  0x37   : > { %v237_v36 = vsub.f32 %v964_v31, %v235_v33  ;;  %v238_v40 = vpack.c.bf16 %v236_v35, %v236_v35  ;;  %v405_v30 = vunpack.c.l.b16 %v950_v9  ;;  %vm307_vm3 = vcmask 523264  }
  0x38   : > { %433 = vrot.lane.b32.xlu1 %v432_v8, %s842_s29  ;;  %v256_v19 = vpack.c.bf16 %v254_v17, %v254_v17  ;;  %v292_v20 = vunpack.c.l.b16 %v255_v18  ;;  %vm310_vm4 = vcmask 654336   ;;  %vm349_vm5 = vcmask 785408  }
  0x39   : > { %v239_v27 = vpack.c.bf16 %v237_v36, %v237_v36  ;;  %v285_v34 = vunpack.c.l.b16 %v238_v40  ;;  %462 = vmatpush.bf16.msra.mxu1 %v636_v43  ;;  %359 = vmatpush.bf16.msra.mxu0 %v636_v43  ;;  %v406_v31 = vpack.c.b16 %v405_v30, %v404_v39  ;;  %v259_v51 = vunpack.c.l.b16 %v952_v10 }
  0x3a   : > { %274 = vrot.lane.b32.xlu0 %v273_v12, %s840_s21  ;;  %v293_v22 = vunpack.c.l.b16 %v256_v19  ;;  %v260_v52 = vunpack.c.l.b16 %v954_v11  ;;  %vm477_vm6 = vcmask 523520  }
  0x3b   : > { %v286_v41 = vunpack.c.l.b16 %v239_v27 }
  0x3c   : > { %v294_v23 = vpack.c.b16 %v293_v22, %v292_v20  ;;  %v261_v53 = vpack.c.b16 %v260_v52, %v259_v51 }
  0x3d   : > { %v287_v42 = vpack.c.b16 %v286_v41, %v285_v34 }
  0x3e   : > { %267 = vrot.lane.b32.xlu2 %v266_v28, %s838_s16 }
  0x40   : > { %281 = vrot.lane.b32.xlu1 %v280_v21, %s839_s17 }
  0x42   : > { %295 = vrot.lane.b32.xlu0 %v294_v23, %s841_s28 }
  0x46   : > { %288 = vrot.lane.b32.xlu2 %v287_v42, %s842_s29 }
  0x90   : > { %v441_v48 = vpop.permute.xlu2 %440 }
  0x98   : > { %v268_v55 = vpop.permute.xlu2 %267 }
  0x99   : > { %v300_v56 = vsel %vm297_vm0, %v261_v53, %v268_v55 }
  0x9c   : > { %v413_v38 = vpop.permute.xlu0 %412 }
  0x9d   : > { %v444_v46 = vsel %vm297_vm0, %v406_v31, %v413_v38 }
  0xa0   : > { %v289_v61 = vpop.permute.xlu2 %288 }
  0xa2   : > { %v427_v44 = vpop.permute.xlu1 %426 }
  0xa4   : > { %v420_v45 = vpop.permute.xlu0 %419 }
  0xa5   : > { %v446_v47 = vsel %vm301_vm1, %v444_v46, %v420_v45 }
  0xa6   : > { %v448_v49 = vsel %vm304_vm2, %v446_v47, %v427_v44 }
  0xaa   : > { %v434_v50 = vpop.permute.xlu1 %433 }
  0xab   : > { %v450_v6 = vsel %vm307_vm3, %v448_v49, %v434_v50 }
  0xac   : > { %v452_v9 = vsel %vm310_vm4, %v450_v6, %v441_v48  ;;  %v275_v54 = vpop.permute.xlu0 %274 }
  0xad   : > { %631 = vmatmul.msk.bf16.vlgmr.msra.gmra.mxu1 %vm349_vm5, %v452_v9  ;;  %v303_v57 = vsel %vm301_vm1, %v300_v56, %v275_v54 }
  0xb2   : > { %v282_v58 = vpop.permute.xlu1 %281 }
  0xb3   : > { %v306_v59 = vsel %vm304_vm2, %v303_v57, %v282_v58 }
  0xb4   : > { %v296_v60 = vpop.permute.xlu0 %295  ;;  %v309_v62 = vsel %vm307_vm3, %v306_v59, %v289_v61 }
  0xb5   : > { %v312_v10 = vsel %vm310_vm4, %v309_v62, %v296_v60 }
  0xb6   : > { %626 = vmatmul.msk.bf16.vlgmr.msra.gmra.mxu0 %vm349_vm5, %v312_v10 }
 0x12a   : > { %v464_v11 = vpop.f32.mrf.mxu1 }
 0x12b   : > { %471 = vrot.lane.b32.xlu1 %v464_v11, %s840_s21 }
 0x132   : > { %v466_v63 = vpop.f32.mrf.mxu1 }
 0x133   : > { %473 = vrot.lane.b32.xlu2 %v466_v63, %s840_s21  ;;  %v361_v0 = vpop.f32.mrf.mxu0 }
 0x134   : > { %366 = vst.msk [vmem:[%s209_s6] sm:$0xff] %vm301_vm1, %v361_v0 }
 0x13b   : > { %v363_v1 = vpop.f32.mrf.mxu0 }
 0x13c   : > { %367 = vst.msk [vmem:[%s209_s6 + $0x8] sm:$0xff] %vm301_vm1, %v363_v1 }
 0x18d   : > { %v474_v2 = vpop.permute.xlu2 %473 }
 0x18e   : > { %479 = vst.msk [vmem:[%s209_s6 + $0x8] sm:$0xff] %vm477_vm6, %v474_v2 }
 0x19d   : > { %v472_v3 = vpop.permute.xlu1 %471 }
 0x19e   : > { %478 = vst.msk [vmem:[%s209_s6] sm:$0xff] %vm477_vm6, %v472_v3 }
 0x19f PF: > { %s16_s14 = sadd.s32 1, %s831_s14   ;;  %s1044_s9 = smov %s815_s10 }
 0x1a0   : > { %p13_p2 = scmp.ge.s32.totalorder %s16_s14, 4   ;;  %s1045_s10 = smov %s819_s11 }
 0x1a1   : > { %s1046_s11 = smov %s928_s5  ;;  %s1047_s12 = smov %s827_s13 }
 0x1a2   : > { %s1048_s13 = smov %s1050_s26  ;;  %15 = sbr.rel (!%p13_p2) target bundleno = 5 (0x5), region = 76 }
 0x1a7   :  { %510 = vsyncpa [#allocation3], 1 }
 0x1a8   :  { %512 = vsyncpa [#allocation3 + $0x1], 1 }
 0x1a9   :  { %513 = vsyncpa [#allocation5], 1 }
 0x1aa   :  { %515 = vsyncpa [#allocation5 + $0x1], 1 }

</bundles_post_ra>
